<compile_context>
chip_gen: v7x
topology: tpu7x:2x2x1
jax: 0.10.0
libtpu: 0.0.40
codegen_flags: <defaults>
</compile_context>

<pallas_src>
import functools

import jax
import jax.numpy as jnp
from jax import lax
from jax.experimental import pallas as pl
from jax.experimental.pallas import tpu as pltpu

NEG_INF = -1e30
LEAKY_SLOPE = 0.01                     # F.leaky_relu default negative_slope
HIGHEST = lax.Precision.HIGHEST


# --------------------------- Pallas kernel: one GAT layer ---------------------------

def _gat_layer_kernel(h_all_ref, h_tile_ref, wz_ref, wdst_ref, wsrc_t_ref, adj_ref,
                      out_ref, *, num_heads, head_dim, apply_elu, mxu_bf16):
    """One multi-head GAT layer for one tile of destination rows.

    h_all_ref   [N, Fin]     all node features (resident across the grid)
    h_tile_ref  [T, Fin]     features of this tile's destination rows
    wz_ref      [Fin, H*D]   per-head projection, head-major column blocks
    wdst_ref    [Fin, H]     column h = W_h @ a_dst_h   (folded dst-score vector)
    wsrc_t_ref  [H, Fin]     row    h = (W_h @ a_src_h) (folded src-score vector)
    adj_ref     [T, N] int8  adj[i, j] != 0  <=>  edge j -> i exists
    out_ref     [T, H*D]
    """
    mxu_dt = jnp.bfloat16 if mxu_bf16 else jnp.float32
    h_all = h_all_ref[...]
    h_all_mxu = h_all.astype(mxu_dt)

    # Projections of *all* source nodes (every dst tile attends over all of them).
    z_all = jnp.dot(h_all_mxu, wz_ref[...].astype(mxu_dt),
                    preferred_element_type=jnp.float32)                    # [N, H*D]
    # Src scores, produced row-oriented ([H, N]) so no in-kernel transpose is needed.
    s_src = lax.dot_general(wsrc_t_ref[...].astype(mxu_dt), h_all_mxu,
                            (((1,), (1,)), ((), ())),
                            preferred_element_type=jnp.float32)            # [H, N]
    # Dst scores only for this tile's rows.
    s_dst = jnp.dot(h_tile_ref[...].astype(mxu_dt), wdst_ref[...].astype(mxu_dt),
                    preferred_element_type=jnp.float32)                    # [T, H]

    adj_mask = adj_ref[...] != 0                                           # [T, N]

    for hh in range(num_heads):                                            # static unroll
        z_h = z_all[:, hh * head_dim:(hh + 1) * head_dim]                  # [N, D]
        # e[i, j] = a_dst . z_i + a_src . z_j  (dst = tile row i, src = column j)
        e = s_dst[:, hh:hh + 1] + s_src[hh:hh + 1, :]                      # [T, N]
        e = jnp.where(e > 0, e, LEAKY_SLOPE * e)                           # leaky_relu
        e = jnp.where(adj_mask, e, NEG_INF)
        m = jnp.max(e, axis=1, keepdims=True)                              # finite (self loops)
        p = jnp.exp(e - m)                                                 # masked -> exactly 0
        s = jnp.maximum(jnp.sum(p, axis=1, keepdims=True), 1e-30)          # guard empty rows
        alpha = p / s                                                      # exact softmax
        agg = jnp.dot(alpha.astype(mxu_dt), z_h.astype(mxu_dt),
                      preferred_element_type=jnp.float32)                  # [T, D]
        if apply_elu:
            agg = jnp.where(agg > 0, agg, jnp.exp(agg) - 1.0)              # fused F.elu
        # Direct slab store per head -- no jnp.concatenate / lane relayout.
        out_ref[:, hh * head_dim:(hh + 1) * head_dim] = agg


# --------------------------- per-layer wrapper ---------------------------

def _gat_layer(x, wz, wdst, wsrc_t, adj_i8, *, num_heads, head_dim, apply_elu,
               mxu_bf16=False, tile_rows=256):
    """One pallas_call; 1-D grid over dst-row tiles, src axis fully resident."""
    n, fin = x.shape
    width = num_heads * head_dim
    # v7x has 64 MiB physical VMEM per TC (vs 128 on v5e/v6e): keep
    # 2 * (adj tile + score plane + output tile) well under ~24 MiB there.
    tile = min(tile_rows, n)
    assert n % tile == 0, "dst-row tile size must divide the number of nodes"
    grid = (n // tile,)

    kernel = functools.partial(_gat_layer_kernel, num_heads=num_heads,
                               head_dim=head_dim, apply_elu=apply_elu,
                               mxu_bf16=mxu_bf16)
    resident = lambda i: (0, 0)        # same block every step -> stays in VMEM
    tiled = lambda i: (i, 0)

    return pl.pallas_call(
        kernel,
        out_shape=jax.ShapeDtypeStruct((n, width), jnp.float32),
        grid=grid,
        in_specs=[
            pl.BlockSpec((n, fin), resident),            # h, all nodes (resident)
            pl.BlockSpec((tile, fin), tiled),            # h, this dst tile
            pl.BlockSpec((fin, width), resident),        # W (all heads)
            pl.BlockSpec((fin, num_heads), resident),    # W @ a_dst
            pl.BlockSpec((num_heads, fin), resident),    # (W @ a_src)^T
            pl.BlockSpec((tile, n), tiled),              # adjacency rows (int8)
        ],
        out_specs=pl.BlockSpec((tile, width), tiled),
        compiler_params=pltpu.CompilerParams(
            dimension_semantics=("parallel",),           # v7x: shard dst tiles over 2 TCs
            vmem_limit_bytes=32 * 1024 * 1024,
        ),
    )(x, x, wz, wdst, wsrc_t, adj_i8)


def gat_forward(h, params, adj, *, mxu_bf16=False, tile_rows=256):
    """Full GAT forward: layer-1 (all heads, fused ELU) -> layer-2 (single head)."""
    num_heads, fin, d1 = params["w1"].shape
    d2 = params["w2"].shape[-1]

    # int8 adjacency (perf review): 4x less HBM / VMEM / DMA than f32.
    adj_i8 = (adj != 0).astype(jnp.int8)

    # ---- layer 1: fold attention vectors into [Fin]-sized columns / rows ----
    w1 = params["w1"]                                                        # [H, Fin, D1]
    w1_cols = jnp.transpose(w1, (1, 0, 2)).reshape(fin, num_heads * d1)      # [Fin, H*D1]
    wdst1 = jnp.einsum("hfd,hod->fh", w1, params["a_dst1"], precision=HIGHEST)   # [Fin, H]
    wsrc1_t = jnp.einsum("hfd,hod->hf", w1, params["a_src1"], precision=HIGHEST)  # [H, Fin]
    h1 = _gat_layer(h, w1_cols, wdst1, wsrc1_t, adj_i8,
                    num_heads=num_heads, head_dim=d1, apply_elu=True,
                    mxu_bf16=mxu_bf16, tile_rows=tile_rows)                  # [N, H*D1]

    # ---- layer 2: single head ----
    w2 = params["w2"][0]                                                     # [H*D1, D2]
    wdst2 = jnp.dot(w2, params["a_dst2"][0].T, precision=HIGHEST)            # [H*D1, 1]
    wsrc2_t = jnp.dot(w2, params["a_src2"][0].T, precision=HIGHEST).T        # [1, H*D1]
    return _gat_layer(h1, w2, wdst2, wsrc2_t, adj_i8,
                      num_heads=1, head_dim=d2, apply_elu=False,
                      mxu_bf16=mxu_bf16, tile_rows=tile_rows)                # [N, D2]


# --------------------------- params / pure-JAX reference ---------------------------

def xavier_normal(key, shape, gain):
    fan_out, fan_in = shape  # torch Linear weight layout: [out_features, in_features]
    std = gain * (2.0 / (fan_in + fan_out)) ** 0.5
    return std * jax.random.normal(key, shape, dtype=jnp.float32)


def init_gat_params(key, in_dim, hidden_dim, out_dim, num_heads):
    gain = 2.0 ** 0.5  # nn.init.calculate_gain('relu')
    keys = jax.random.split(key, 2 * num_heads + 2)
    w1, asrc1, adst1 = [], [], []
    for i in range(num_heads):
        fc_w = xavier_normal(keys[2 * i], (hidden_dim, in_dim), gain)        # [out, in]
        at_w = xavier_normal(keys[2 * i + 1], (1, 2 * hidden_dim), gain)     # [1, 2*out]
        w1.append(fc_w.T)                                                    # [in, out]
        asrc1.append(at_w[:, :hidden_dim])
        adst1.append(at_w[:, hidden_dim:])
    fc2_w = xavier_normal(keys[-2], (out_dim, hidden_dim * num_heads), gain)
    at2_w = xavier_normal(keys[-1], (1, 2 * out_dim), gain)
    return {
        "w1": jnp.stack(w1),                       # [H, in, hid]
        "a_src1": jnp.stack(asrc1),                # [H, 1, hid]
        "a_dst1": jnp.stack(adst1),                # [H, 1, hid]
        "w2": fc2_w.T[None],                       # [1, H*hid, out]
        "a_src2": at2_w[:, :out_dim][None],        # [1, 1, out]
        "a_dst2": at2_w[:, out_dim:][None],        # [1, 1, out]
    }


def _gat_head_ref(h, w, a_src, a_dst, adj):
    # a_src / a_dst: [1, D].  Matmuls pinned to HIGHEST so the reference is exact f32.
    z = jnp.dot(h, w, precision=HIGHEST)                          # [N, D]
    s_src = jnp.dot(z, a_src[0], precision=HIGHEST)               # [N]
    s_dst = jnp.dot(z, a_dst[0], precision=HIGHEST)               # [N]
    e = s_dst[:, None] + s_src[None, :]                           # dst rows, src cols
    e = jnp.where(e > 0, e, LEAKY_SLOPE * e)
    e = jnp.where(adj > 0, e, NEG_INF)
    e = e - e.max(axis=1, keepdims=True)
    p = jnp.where(adj > 0, jnp.exp(e), 0.0)
    alpha = p / p.sum(axis=1, keepdims=True)
    return jnp.dot(alpha, z, precision=HIGHEST)


def gat_forward_ref(h, params, adj):
    heads = [_gat_head_ref(h, params["w1"][i], params["a_src1"][i],
                           params["a_dst1"][i], adj)
             for i in range(params["w1"].shape[0])]
    h1 = jnp.concatenate(heads, axis=1)
    h1 = jnp.where(h1 > 0, h1, jnp.exp(h1) - 1.0)                 # F.elu
    return _gat_head_ref(h1, params["w2"][0], params["a_src2"][0],
                         params["a_dst2"][0], adj)


# --------------------------- main ---------------------------

if __name__ == "__main__":
    N, in_dim, hidden_dim, out_dim, num_heads = 64, 16, 16, 8, 2

    key = jax.random.PRNGKey(0)
    k_feat, k_adj, k_par = jax.random.split(key, 3)

    # node features
    h = jax.random.normal(k_feat, (N, in_dim), dtype=jnp.float32)

    # random directed graph + self loops (every node has >= 1 incoming edge,
    # matching DGL behaviour where the reduce runs over a non-empty mailbox).
    adj = (jax.random.uniform(k_adj, (N, N)) < 0.3).astype(jnp.float32)
    adj = jnp.maximum(adj, jnp.eye(N, dtype=jnp.float32))

    params = init_gat_params(k_par, in_dim, hidden_dim, out_dim, num_heads)

    # f32 path: bit-for-bit comparable against the exact-precision JAX reference.
    out = jax.block_until_ready(gat_forward(h, params, adj))
    ref = gat_forward_ref(h, params, adj)
    assert out.shape == (N, out_dim)
    max_err = float(jnp.max(jnp.abs(out - ref)))
    assert jnp.allclose(out, ref, rtol=2e-3, atol=2e-3), \
        f"Pallas GAT mismatch vs JAX reference (max abs err {max_err})"
    assert bool(jnp.isfinite(out).all()), "non-finite values in Pallas GAT output"

    # bf16 MXU-operand fast path (v6e/v7x perf suggestion): sanity check it runs.
    out_bf16 = jax.block_until_ready(gat_forward(h, params, adj, mxu_bf16=True))
    assert out_bf16.shape == (N, out_dim)
    assert bool(jnp.isfinite(out_bf16).all()), "non-finite values in bf16 MXU path"

    print("KERNEL_OK")
</pallas_src>

<mosaic_0001>
module attributes {stable_mosaic.version = 11 : i64} {
  func.func @_gat_layer_kernel(%arg0: i32, %arg1: memref<64x16xf32, #tpu.memory_space<vmem>>, %arg2: memref<64x16xf32, #tpu.memory_space<vmem>>, %arg3: memref<16x32xf32, #tpu.memory_space<vmem>>, %arg4: memref<16x2xf32, #tpu.memory_space<vmem>>, %arg5: memref<2x16xf32, #tpu.memory_space<vmem>>, %arg6: memref<64x64xi8, #tpu.memory_space<vmem>>, %arg7: memref<64x32xf32, #tpu.memory_space<vmem>>) attributes {dimension_semantics = [#tpu.dimension_semantics<parallel>], iteration_bounds = array<i64: 1>, scalar_prefetch = 0 : i64, scratch_operands = 0 : i64, tpu.core_type = #tpu.core_type<tc>, window_params = [{pipeline_mode = #tpu.pipeline_mode<synchronous>, transform_indices = @transform_0, window_bounds = array<i64: 64, 16>}, {transform_indices = @transform_1, window_bounds = array<i64: 64, 16>}, {pipeline_mode = #tpu.pipeline_mode<synchronous>, transform_indices = @transform_2, window_bounds = array<i64: 16, 32>}, {pipeline_mode = #tpu.pipeline_mode<synchronous>, transform_indices = @transform_3, window_bounds = array<i64: 16, 2>}, {pipeline_mode = #tpu.pipeline_mode<synchronous>, transform_indices = @transform_4, window_bounds = array<i64: 2, 16>}, {transform_indices = @transform_5, window_bounds = array<i64: 64, 64>}, {transform_indices = @transform_6, window_bounds = array<i64: 64, 32>}]} {
    %c0 = arith.constant 0 : index
    %c0_0 = arith.constant 0 : index
    %0 = vector.load %arg1[%c0, %c0_0] : memref<64x16xf32, #tpu.memory_space<vmem>>, vector<64x16xf32>
    %c0_1 = arith.constant 0 : index
    %c0_2 = arith.constant 0 : index
    %1 = vector.load %arg3[%c0_1, %c0_2] : memref<16x32xf32, #tpu.memory_space<vmem>>, vector<16x32xf32>
    %cst = arith.constant dense<0.000000e+00> : vector<64x32xf32>
    %2 = tpu.matmul %0, %1, %cst {dimension_numbers = #tpu.dot_dimension_numbers<[1], [0], [0], [1], [0, 0, 1, 1], [], []>} : vector<64x16xf32>, vector<16x32xf32>, vector<64x32xf32> -> vector<64x32xf32>
    %c0_3 = arith.constant 0 : index
    %c0_4 = arith.constant 0 : index
    %3 = vector.load %arg5[%c0_3, %c0_4] : memref<2x16xf32, #tpu.memory_space<vmem>>, vector<2x16xf32>
    %cst_5 = arith.constant dense<0.000000e+00> : vector<2x64xf32>
    %4 = tpu.matmul %3, %0, %cst_5 {dimension_numbers = #tpu.dot_dimension_numbers<[1], [1], [0], [0], [0, 0, 1, 0], [], []>} : vector<2x16xf32>, vector<64x16xf32>, vector<2x64xf32> -> vector<2x64xf32>
    %c0_6 = arith.constant 0 : index
    %c0_7 = arith.constant 0 : index
    %5 = vector.load %arg2[%c0_6, %c0_7] : memref<64x16xf32, #tpu.memory_space<vmem>>, vector<64x16xf32>
    %c0_8 = arith.constant 0 : index
    %c0_9 = arith.constant 0 : index
    %6 = vector.load %arg4[%c0_8, %c0_9] : memref<16x2xf32, #tpu.memory_space<vmem>>, vector<16x2xf32>
    %cst_10 = arith.constant dense<0.000000e+00> : vector<64x2xf32>
    %7 = tpu.matmul %5, %6, %cst_10 {dimension_numbers = #tpu.dot_dimension_numbers<[1], [0], [0], [1], [0, 0, 1, 1], [], []>} : vector<64x16xf32>, vector<16x2xf32>, vector<64x2xf32> -> vector<64x2xf32>
    %c0_11 = arith.constant 0 : index
    %c0_12 = arith.constant 0 : index
    %8 = vector.load %arg6[%c0_11, %c0_12] : memref<64x64xi8, #tpu.memory_space<vmem>>, vector<64x64xi8>
    %c0_i8 = arith.constant 0 : i8
    %9 = vector.broadcast %c0_i8 : i8 to vector<64x64xi8>
    %10 = arith.cmpi ne, %8, %9 : vector<64x64xi8>
    %11 = vector.extract_strided_slice %2 {offsets = [0, 0], sizes = [64, 16], strides = [1, 1]} : vector<64x32xf32> to vector<64x16xf32>
    %12 = vector.extract_strided_slice %7 {offsets = [0, 0], sizes = [64, 1], strides = [1, 1]} : vector<64x2xf32> to vector<64x1xf32>
    %13 = vector.extract_strided_slice %4 {offsets = [0, 0], sizes = [1, 64], strides = [1, 1]} : vector<2x64xf32> to vector<1x64xf32>
    %14 = vector.broadcast %12 : vector<64x1xf32> to vector<64x64xf32>
    %15 = vector.broadcast %13 : vector<1x64xf32> to vector<64x64xf32>
    %16 = arith.addf %14, %15 : vector<64x64xf32>
    %cst_13 = arith.constant 0.000000e+00 : f32
    %17 = vector.broadcast %cst_13 : f32 to vector<64x64xf32>
    %18 = arith.cmpf ogt, %16, %17 : vector<64x64xf32>
    %cst_14 = arith.constant 0.00999999977 : f32
    %19 = vector.broadcast %cst_14 : f32 to vector<64x64xf32>
    %20 = arith.mulf %19, %16 : vector<64x64xf32>
    %21 = arith.select %18, %16, %20 : vector<64x64xi1>, vector<64x64xf32>
    %cst_15 = arith.constant -1.000000e+30 : f32
    %22 = vector.broadcast %cst_15 : f32 to vector<64x64xf32>
    %23 = arith.select %10, %21, %22 : vector<64x64xi1>, vector<64x64xf32>
    %cst_16 = arith.constant dense<0xFF800000> : vector<64xf32>
    %24 = vector.multi_reduction <maximumf>, %23, %cst_16 [1] : vector<64x64xf32> to vector<64xf32>
    %25 = vector.shape_cast %24 : vector<64xf32> to vector<64x1xf32>
    %26 = vector.broadcast %25 : vector<64x1xf32> to vector<64x64xf32>
    %27 = arith.subf %23, %26 : vector<64x64xf32>
    %28 = math.exp %27 : vector<64x64xf32>
    %cst_17 = arith.constant dense<0.000000e+00> : vector<64xf32>
    %29 = vector.multi_reduction <add>, %28, %cst_17 [1] : vector<64x64xf32> to vector<64xf32>
    %30 = vector.shape_cast %29 : vector<64xf32> to vector<64x1xf32>
    %cst_18 = arith.constant 1.000000e-30 : f32
    %31 = vector.broadcast %cst_18 : f32 to vector<64x1xf32>
    %32 = arith.maximumf %30, %31 : vector<64x1xf32>
    %33 = vector.broadcast %32 : vector<64x1xf32> to vector<64x64xf32>
    %34 = arith.divf %28, %33 : vector<64x64xf32>
    %cst_19 = arith.constant dense<0.000000e+00> : vector<64x16xf32>
    %35 = tpu.matmul %34, %11, %cst_19 {dimension_numbers = #tpu.dot_dimension_numbers<[1], [0], [0], [1], [0, 0, 1, 1], [], []>} : vector<64x64xf32>, vector<64x16xf32>, vector<64x16xf32> -> vector<64x16xf32>
    %cst_20 = arith.constant 0.000000e+00 : f32
    %36 = vector.broadcast %cst_20 : f32 to vector<64x16xf32>
    %37 = arith.cmpf ogt, %35, %36 : vector<64x16xf32>
    %38 = math.exp %35 : vector<64x16xf32>
    %cst_21 = arith.constant 1.000000e+00 : f32
    %39 = vector.broadcast %cst_21 : f32 to vector<64x16xf32>
    %40 = arith.subf %38, %39 : vector<64x16xf32>
    %41 = arith.select %37, %35, %40 : vector<64x16xi1>, vector<64x16xf32>
    %c0_22 = arith.constant 0 : index
    %c0_23 = arith.constant 0 : index
    %42 = vector.load %arg7[%c0_22, %c0_23] : memref<64x32xf32, #tpu.memory_space<vmem>>, vector<64x16xf32>
    tpu.vector_store %arg7[%c0_22, %c0_23], %41 {strides = array<i32>} : memref<64x32xf32, #tpu.memory_space<vmem>>, vector<64x16xf32>,
    %43 = vector.extract_strided_slice %2 {offsets = [0, 16], sizes = [64, 16], strides = [1, 1]} : vector<64x32xf32> to vector<64x16xf32>
    %44 = vector.extract_strided_slice %7 {offsets = [0, 1], sizes = [64, 1], strides = [1, 1]} : vector<64x2xf32> to vector<64x1xf32>
    %45 = vector.extract_strided_slice %4 {offsets = [1, 0], sizes = [1, 64], strides = [1, 1]} : vector<2x64xf32> to vector<1x64xf32>
    %46 = vector.broadcast %44 : vector<64x1xf32> to vector<64x64xf32>
    %47 = vector.broadcast %45 : vector<1x64xf32> to vector<64x64xf32>
    %48 = arith.addf %46, %47 : vector<64x64xf32>
    %cst_24 = arith.constant 0.000000e+00 : f32
    %49 = vector.broadcast %cst_24 : f32 to vector<64x64xf32>
    %50 = arith.cmpf ogt, %48, %49 : vector<64x64xf32>
    %cst_25 = arith.constant 0.00999999977 : f32
    %51 = vector.broadcast %cst_25 : f32 to vector<64x64xf32>
    %52 = arith.mulf %51, %48 : vector<64x64xf32>
    %53 = arith.select %50, %48, %52 : vector<64x64xi1>, vector<64x64xf32>
    %cst_26 = arith.constant -1.000000e+30 : f32
    %54 = vector.broadcast %cst_26 : f32 to vector<64x64xf32>
    %55 = arith.select %10, %53, %54 : vector<64x64xi1>, vector<64x64xf32>
    %cst_27 = arith.constant dense<0xFF800000> : vector<64xf32>
    %56 = vector.multi_reduction <maximumf>, %55, %cst_27 [1] : vector<64x64xf32> to vector<64xf32>
    %57 = vector.shape_cast %56 : vector<64xf32> to vector<64x1xf32>
    %58 = vector.broadcast %57 : vector<64x1xf32> to vector<64x64xf32>
    %59 = arith.subf %55, %58 : vector<64x64xf32>
    %60 = math.exp %59 : vector<64x64xf32>
    %cst_28 = arith.constant dense<0.000000e+00> : vector<64xf32>
    %61 = vector.multi_reduction <add>, %60, %cst_28 [1] : vector<64x64xf32> to vector<64xf32>
    %62 = vector.shape_cast %61 : vector<64xf32> to vector<64x1xf32>
    %cst_29 = arith.constant 1.000000e-30 : f32
    %63 = vector.broadcast %cst_29 : f32 to vector<64x1xf32>
    %64 = arith.maximumf %62, %63 : vector<64x1xf32>
    %65 = vector.broadcast %64 : vector<64x1xf32> to vector<64x64xf32>
    %66 = arith.divf %60, %65 : vector<64x64xf32>
    %cst_30 = arith.constant dense<0.000000e+00> : vector<64x16xf32>
    %67 = tpu.matmul %66, %43, %cst_30 {dimension_numbers = #tpu.dot_dimension_numbers<[1], [0], [0], [1], [0, 0, 1, 1], [], []>} : vector<64x64xf32>, vector<64x16xf32>, vector<64x16xf32> -> vector<64x16xf32>
    %cst_31 = arith.constant 0.000000e+00 : f32
    %68 = vector.broadcast %cst_31 : f32 to vector<64x16xf32>
    %69 = arith.cmpf ogt, %67, %68 : vector<64x16xf32>
    %70 = math.exp %67 : vector<64x16xf32>
    %cst_32 = arith.constant 1.000000e+00 : f32
    %71 = vector.broadcast %cst_32 : f32 to vector<64x16xf32>
    %72 = arith.subf %70, %71 : vector<64x16xf32>
    %73 = arith.select %69, %67, %72 : vector<64x16xi1>, vector<64x16xf32>
    %c0_33 = arith.constant 0 : index
    %c16 = arith.constant 16 : index
    %74 = vector.load %arg7[%c0_33, %c16] : memref<64x32xf32, #tpu.memory_space<vmem>>, vector<64x16xf32>
    tpu.vector_store %arg7[%c0_33, %c16], %73 {strides = array<i32>} : memref<64x32xf32, #tpu.memory_space<vmem>>, vector<64x16xf32>,
    return
  }
  func.func @transform_0(%arg0: i32) -> (i32, i32) {
    %c0_i32 = arith.constant 0 : i32
    %c0_i32_0 = arith.constant 0 : i32
    %c0_i32_1 = arith.constant 0 : i32
    return %c0_i32, %c0_i32_0 : i32, i32
  }
  func.func @transform_1(%arg0: i32) -> (i32, i32) {
    %c0_i32 = arith.constant 0 : i32
    %c0_i32_0 = arith.constant 0 : i32
    return %arg0, %c0_i32 : i32, i32
  }
  func.func @transform_2(%arg0: i32) -> (i32, i32) {
    %c0_i32 = arith.constant 0 : i32
    %c0_i32_0 = arith.constant 0 : i32
    %c0_i32_1 = arith.constant 0 : i32
    return %c0_i32, %c0_i32_0 : i32, i32
  }
  func.func @transform_3(%arg0: i32) -> (i32, i32) {
    %c0_i32 = arith.constant 0 : i32
    %c0_i32_0 = arith.constant 0 : i32
    %c0_i32_1 = arith.constant 0 : i32
    return %c0_i32, %c0_i32_0 : i32, i32
  }
  func.func @transform_4(%arg0: i32) -> (i32, i32) {
    %c0_i32 = arith.constant 0 : i32
    %c0_i32_0 = arith.constant 0 : i32
    %c0_i32_1 = arith.constant 0 : i32
    return %c0_i32, %c0_i32_0 : i32, i32
  }
  func.func @transform_5(%arg0: i32) -> (i32, i32) {
    %c0_i32 = arith.constant 0 : i32
    %c0_i32_0 = arith.constant 0 : i32
    return %arg0, %c0_i32 : i32, i32
  }
  func.func @transform_6(%arg0: i32) -> (i32, i32) {
    %c0_i32 = arith.constant 0 : i32
    %c0_i32_0 = arith.constant 0 : i32
    return %arg0, %c0_i32 : i32, i32
  }
}

</mosaic_0001>

<bundles_post_ra>
// kernel: tpu_custom_call.1
= control target key start
LH: loop header
LB: loop body
LE: loop exit
PB: predicated region body
PF: predicated region fallthrough
CT: control target
= control target key end

     0   :  { %vm35_vm0 = vcmask 130048   ;;  %v1636_v3 = vmov 0.0|0.0   ;;  %vm1637_vm1 = vmmov 0   ;;  %v1638_v4 = vmov 0.0   ;;  %s1642_s24 = smov 16   ;;  %s2223_s2 = inlined_call_operand.vmem [shape: f32[16,32], index: 2, kind: input, shape index: {}]   ;;  %s2224_s0 = inlined_call_operand.vmem [shape: f32[64,16], index: 0, kind: input, shape index: {}]   ;;  %s2225_s3 = inlined_call_operand.vmem [shape: f32[16,2], index: 3, kind: input, shape index: {}]   ;;  %s2226_s1 = inlined_call_operand.vmem [shape: f32[64,16], index: 1, kind: input, shape index: {}]   ;;  %s2227_s4 = inlined_call_operand.vmem [shape: f32[2,16], index: 4, kind: input, shape index: {}]   ;;  %s2228_s5 = inlined_call_operand.vmem [shape: s8[64,64], index: 5, kind: input, shape index: {}]   ;;  %s2229_s6 = inlined_call_operand.vmem [shape: f32[64,32], index: 6, kind: output, shape index: {}]  }
   0x1   :  { %v33_v0 = vld [vmem:[%s2223_s2] sm:$0xff]  ;;  %v34_v1 = vld [vmem:[%s2223_s2 + $0x8] sm:$0xff]  ;;  %1445 = vmatprep.subr.bf16.mxu1 %v1636_v3  ;;  %1366 = vmatprep.mubr.msk.f32.mxu1 %vm1637_vm1, %v1638_v4  ;;  %v27_v11 = vld [vmem:[%s2224_s0 + $0x10] sm:$0xff]  ;;  %v1639_v30 = vmov 0   ;;  %v1640_v52 = vmov 1   ;;  %v422_v62 = vlaneseq  ;;  %vm524_vm10 = vcmask 523264  }
   0x2   :  { %v25_v2 = vld [vmem:[%s2224_s0] sm:$0xff]  ;;  %v1441_v5 = vpack.c.bf16 %v34_v1, %v33_v0  ;;  %v248_v7 = vld [vmem:[%s2225_s3 + $0x8] sm:$0xff]  ;;  %vm1702_vm2 = vmpackc.low %vm35_vm0, %vm35_vm0  ;;  %1512 = vset.pattern.permute.xlu0 %v1639_v30  ;;  %1514 = vset.pattern.permute.xlu1 %v1639_v30 }
   0x3   :  { %1338 = vmatprep.mubr.msk.f32.mxu0 %vm35_vm0, %v25_v2  ;;  %v247_v6 = vld [vmem:[%s2225_s3] sm:$0xff]  ;;  %v26_v8 = vld [vmem:[%s2224_s0 + $0x8] sm:$0xff]  ;;  %v28_v13 = vld [vmem:[%s2224_s0 + $0x18] sm:$0xff] }
   0x4   :  { %v1461_v9 = vpack.c.bf16 %v248_v7, %v247_v6  ;;  %1442 = vmatprep.subr.bf16.mxu0 %v1441_v5  ;;  %v1446_v10 = vpack.c.bf16 %v26_v8, %v25_v2  ;;  %v29_v14 = vld [vmem:[%s2224_s0 + $0x20] sm:$0xff]  ;;  %v1450_v15 = vpack.c.bf16 %v28_v13, %v27_v11  ;;  %v30_v16 = vld [vmem:[%s2224_s0 + $0x28] sm:$0xff]  ;;  %v31_v17 = vld [vmem:[%s2224_s0 + $0x30] sm:$0xff]  ;;  %v423_v2 = vshrl.u32 %v422_v62, 7 }
   0x5   :  { %1444 = vmatpush3.bf16.msra.mxu0 %v1441_v5  ;;  %v32_v18 = vld [vmem:[%s2224_s0 + $0x38] sm:$0xff]  ;;  %v239_v19 = vld [vmem:[%s2226_s1] sm:$0xff]  ;;  %v1454_v20 = vpack.c.bf16 %v30_v16, %v29_v14  ;;  %v240_v21 = vld [vmem:[%s2226_s1 + $0x8] sm:$0xff] }
   0x6   :  { %1462 = vmatprep.subr.bf16.mxu0 %v1461_v9  ;;  %1448 = vmatpush3.bf16.xpose.msk.msra.mxu1 %vm1702_vm2, %v1446_v10  ;;  %v241_v22 = vld [vmem:[%s2226_s1 + $0x10] sm:$0xff]  ;;  %v242_v23 = vld [vmem:[%s2226_s1 + $0x18] sm:$0xff]  ;;  %v243_v24 = vld [vmem:[%s2226_s1 + $0x20] sm:$0xff]  ;;  %v1458_v25 = vpack.c.bf16 %v32_v18, %v31_v17  ;;  %v424_v6 = vsub.s32 0, %v423_v2 }
   0x7   :  { %1449 = vmatprep.subr.bf16.mxu1 %v1636_v3  ;;  %v244_v26 = vld [vmem:[%s2226_s1 + $0x28] sm:$0xff]  ;;  %v245_v27 = vld [vmem:[%s2226_s1 + $0x30] sm:$0xff]  ;;  %v246_v28 = vld [vmem:[%s2226_s1 + $0x38] sm:$0xff] }
   0x8   :  { %1339 = vmatmul.mubr.msk.f32.vlgmr.msra.gmra.mrb[0].mxu0 %vm35_vm0, %v26_v8  ;;  %v165_v29 = vld [vmem:[%s2227_s4] sm:$0x3]  ;;  %v379_v10 = vld [vmem:[%s2228_s5 + $0x8] sm:$0xff] }
   0x9   :  { %1464 = vmatpush3.bf16.msra.mxu0 %v1461_v9  ;;  %1341 = vmatprep.mubr.msk.f32.mxu0 %vm35_vm0, %v27_v11  ;;  %v378_v58 = vld [vmem:[%s2228_s5] sm:$0xff]  ;;  %vm381_vm7 = vnez %v379_v10  ;;  %s1641_s5 = smov 112  }
   0xa   :  { %vm380_vm3 = vnez %v378_v58 }
   0xb   :  { %v458_v59 = vsel %vm380_vm3, 16843009, %v1639_v30 }
   0xc   :  { %1342 = vmatmul.mubr.msk.f32.gmra.mrb[2].mxu0 %vm35_vm0, %v28_v13  ;;  %v461_v60 = vunpack.c.1.s8 %v458_v59  ;;  %v460_v61 = vunpack.c.0.s8 %v458_v59  ;;  %v463_v0 = vunpack.c.3.s8 %v458_v59 }
   0xd   :  { %1344 = vmatprep.mubr.msk.f32.mxu0 %vm35_vm0, %v29_v14 }
   0xe   :  { %1452 = vmatpush3.bf16.xpose.msk.msra.mxu1 %vm1702_vm2, %v1450_v15  ;;  %v470_v63 = vpack.c.b16 %v461_v60, %v461_v60  ;;  %v468_v1 = vpack.c.b16 %v460_v61, %v460_v61  ;;  %v474_v4 = vpack.c.b16 %v463_v0, %v463_v0 }
   0xf   :  { %1453 = vmatprep.subr.bf16.mxu1 %v1636_v3 }
  0x10   :  { %1345 = vmatmul.mubr.msk.f32.gmra.mrb[4].mxu0 %vm35_vm0, %v30_v16  ;;  %v469_v5 = vpack.c.b8 %v468_v1, %v468_v1  ;;  %v475_v7 = vpack.c.b8 %v474_v4, %v474_v4  ;;  %v462_v16 = vunpack.c.2.s8 %v458_v59 }
  0x11   :  { %1347 = vmatprep.mubr.msk.f32.mxu0 %vm35_vm0, %v31_v17  ;;  %v832_v17 = vsub.s32 1, %v423_v2 }
  0x12   :  { %vm484_vm5 = vnez %v469_v5  ;;  %vm487_vm6 = vnez %v475_v7 }
  0x13   :  { %v492_v12 = vsel %vm484_vm5, 16843009, %v1639_v30  ;;  %v495_v15 = vsel %vm487_vm6, 16843009, %v1639_v30 }
  0x14   :  { %1348 = vmatmul.mubr.msk.f32.gmra.mrb[6].mxu0 %vm35_vm0, %v32_v18  ;;  %v500_v18 = vunpack.c.0.s8 %v492_v12 }
  0x15   :  { %1373 = vmatprep.mubr.msk.f32.mxu0 %vm35_vm0, %v239_v19 }
  0x16   :  { %1456 = vmatpush3.bf16.xpose.msk.msra.mxu1 %vm1702_vm2, %v1454_v20  ;;  %vm1834_vm11 = vcmp.ne.s32.totalorder %v500_v18, 0 }
  0x17   :  { %1457 = vmatprep.subr.bf16.mxu1 %v1636_v3  ;;  %v471_v3 = vpack.c.b8 %v470_v63, %v470_v63 }
  0x18   :  { %1374 = vmatmul.mubr.msk.f32.vlgmr.msra.gmra.mrb[8].mxu0 %vm35_vm0, %v240_v21  ;;  %v459_v21 = vsel %vm381_vm7, 16843009, %v1639_v30 }
  0x19   :  { %1376 = vmatprep.mubr.msk.f32.mxu0 %vm35_vm0, %v241_v22  ;;  %vm485_vm4 = vnez %v471_v3  ;;  %v467_v63 = vunpack.c.3.s8 %v459_v21  ;;  %v466_v5 = vunpack.c.2.s8 %v459_v21 }
  0x1a   :  { %v493_v8 = vsel %vm485_vm4, 16843009, %v1639_v30 }
  0x1b   :  { %v501_v11 = vunpack.c.0.s8 %v493_v8  ;;  %v482_v10 = vpack.c.b16 %v467_v63, %v467_v63 }
  0x1c   :  { %1377 = vmatmul.mubr.msk.f32.gmra.mrb[10].mxu0 %vm35_vm0, %v242_v23 }
  0x1d   :  { %1379 = vmatprep.mubr.msk.f32.mxu0 %vm35_vm0, %v243_v24  ;;  %vm1821_vm9 = vcmp.ne.s32.totalorder %v501_v11, 0  ;;  %v503_v24 = vunpack.c.0.s8 %v495_v15  ;;  %v480_v15 = vpack.c.b16 %v466_v5, %v466_v5  ;;  %v483_v18 = vpack.c.b8 %v482_v10, %v482_v10 }
  0x1e   :  { %1460 = vmatpush3.bf16.xpose.msk.msra.mxu1 %vm1702_vm2, %v1458_v25 }
  0x1f   :  { %vm1840_vm14 = vcmp.ne.s32.totalorder %v503_v24, 0  ;;  %v481_v24 = vpack.c.b8 %v480_v15, %v480_v15  ;;  %vm491_vm6 = vnez %v483_v18 }
  0x20   :  { %1380 = vmatmul.mubr.msk.f32.gmra.mrb[12].mxu0 %vm35_vm0, %v244_v26 }
  0x21   :  { %1382 = vmatprep.mubr.msk.f32.mxu0 %vm35_vm0, %v245_v27 }
  0x24   :  { %1383 = vmatmul.mubr.msk.f32.gmra.mrb[14].mxu0 %vm35_vm0, %v246_v28  ;;  %v472_v28 = vpack.c.b16 %v462_v16, %v462_v16 }
  0x25   :  { %1367 = vmatmul.mubr.msk.f32.vlgmr.msra.gmra.mrb[0].mxu1 %vm35_vm0, %v165_v29 }
  0xdb   :  { %v1774_v31 = vpop.f32.mrb[0].mxu0 }
  0xdc   :  { %v1776_v32 = vpop.f32.mrb[1].mxu0 }
  0xdd   :  { %v1520_v33 = vpack.i.bf16 %v1774_v31, %v1776_v32  ;;  %v1465_v34 = vpack.c.bf16 %v1774_v31, %v1776_v32 }
  0xdf   :  { %v1782_v35 = vpop.f32.mrb[2].mxu0  ;;  %1466 = vmatprep.subr.bf16.mxu0 %v1465_v34 }
  0xe0   :  { %v1784_v36 = vpop.f32.mrb[3].mxu0  ;;  %1468 = vmatpush3.bf16.msra.mxu0 %v1465_v34 }
  0xe1   :  { %v1525_v37 = vpack.i.bf16 %v1782_v35, %v1784_v36  ;;  %v1469_v38 = vpack.c.bf16 %v1782_v35, %v1784_v36 }
  0xe3   :  { %v1790_v39 = vpop.f32.mrb[4].mxu0  ;;  %1470 = vmatprep.subr.bf16.mxu0 %v1469_v38 }
  0xe4   :  { %v1792_v40 = vpop.f32.mrb[5].mxu0  ;;  %1472 = vmatpush3.bf16.msra.mxu0 %v1469_v38 }
  0xe5   :  { %v1530_v41 = vpack.i.bf16 %v1790_v39, %v1792_v40  ;;  %v1473_v42 = vpack.c.bf16 %v1790_v39, %v1792_v40 }
  0xe7   :  { %v1798_v43 = vpop.f32.mrb[6].mxu0  ;;  %1474 = vmatprep.subr.bf16.mxu0 %v1473_v42 }
  0xe8   :  { %v1800_v44 = vpop.f32.mrb[7].mxu0  ;;  %1476 = vmatpush3.bf16.msra.mxu0 %v1473_v42  ;;  %v465_v42 = vunpack.c.1.s8 %v459_v21 }
  0xe9   :  { %v1535_v45 = vpack.i.bf16 %v1798_v43, %v1800_v44  ;;  %v1477_v46 = vpack.c.bf16 %v1798_v43, %v1800_v44 }
  0xea   :  { %v478_v58 = vpack.c.b16 %v465_v42, %v465_v42 }
  0xeb   :  { %v1375_v47 = vpop.f32.mrb[8].mxu0  ;;  %1478 = vmatprep.subr.bf16.mxu0 %v1477_v46 }
  0xec   :  { %1480 = vmatpush3.bf16.msra.mxu0 %v1477_v46  ;;  %389 = vperm.xlu0 %1512, %v1375_v47   ;;  %v339_v48 = vpop.f32.mrb[9].mxu0  ;;  %v479_v3 = vpack.c.b8 %v478_v58, %v478_v58 }
  0xee   :  { %vm489_vm2 = vnez %v479_v3 }
  0xef   :  { %v1378_v49 = vpop.f32.mrb[10].mxu0 }
  0xf0   :  { %384 = vperm.xlu0 %1512, %v339_v48   ;;  %399 = vperm.xlu1 %1514, %v1378_v49   ;;  %v349_v50 = vpop.f32.mrb[11].mxu0 }
  0xf3   :  { %v1381_v51 = vpop.f32.mrb[12].mxu0 }
  0xf4   :  { %1513 = vset.pattern.permute.xlu0 %v1640_v52  ;;  %1515 = vset.pattern.permute.xlu1 %v1640_v52  ;;  %v359_v53 = vpop.f32.mrb[13].mxu0 }
  0xf5   :  { %799 = vperm.xlu0 %1513, %v339_v48   ;;  %811 = vperm.xlu1 %1515, %v1378_v49  }
  0xf7   :  { %v1384_v54 = vpop.f32.mrb[14].mxu0 }
  0xf8   :  { %v369_v55 = vpop.f32.mrb[15].mxu0  ;;  %v235_v56 = vpop.f32.mrb[0].mxu1 }
  0xf9   :  { %1518 = vset.pattern.permute.xlu0 %v1639_v30  ;;  %1516 = vset.pattern.permute.xlu1 %v1639_v30  ;;  %v1368_v57 = vpop.f32.mrb[1].mxu1  ;;  %v1813_v9 = vrot.slane %v235_v56, %v424_v6  ;;  %v1828_v29 = vrot.slane %v235_v56, %v832_v17  ;;  %v497_v17 = vsel %vm489_vm2, 16843009, %v1639_v30 }
  0xfa   :  { %394 = vperm.xlu1 %1516, %v349_v50   ;;  %409 = vperm.xlu0 %1518, %v1381_v51  }
  0xfe   :  { %1517 = vset.pattern.permute.xlu1 %v1640_v52  ;;  %404 = vperm.xlu0 %1518, %v359_v53  }
  0xff   :  { %807 = vperm.xlu1 %1517, %v349_v50  }
 0x102   :  { %419 = vperm.xlu0 %1518, %v1384_v54  }
 0x103   :  { %819 = vperm.xlu1 %1517, %v1381_v51  }
 0x106   :  { %414 = vperm.xlu0 %1518, %v369_v55  }
 0x107   :  { %815 = vperm.xlu1 %1517, %v359_v53   ;;  %v473_v53 = vpack.c.b8 %v472_v28, %v472_v28 }
 0x109   :  { %vm486_vm1 = vnez %v473_v53 }
 0x10a   :  { %1519 = vset.pattern.permute.xlu0 %v1640_v52  ;;  %v494_v7 = vsel %vm486_vm1, 16843009, %v1639_v30 }
 0x10b   :  { %823 = vperm.xlu1 %1517, %v369_v55   ;;  %827 = vperm.xlu0 %1519, %v1384_v54   ;;  %v464_v54 = vunpack.c.0.s8 %v459_v21 }
 0x10d   :  { %v476_v62 = vpack.c.b16 %v464_v54, %v464_v54  ;;  %v499_v54 = vsel %vm491_vm6, 16843009, %v1639_v30 }
 0x10e   :  { %v507_v3 = vunpack.c.0.s8 %v499_v54 }
 0x10f   :  { %803 = vperm.xlu1 %1517, %v1375_v47   ;;  %v477_v8 = vpack.c.b8 %v476_v62, %v476_v62 }
 0x110   :  { %vm1917_vm1 = vcmp.ne.s32.totalorder %v507_v3, 0 }
 0x111   :  { %vm488_vm3 = vnez %v477_v8 }
 0x112   :  { %v496_v28 = vsel %vm488_vm3, 16843009, %v1639_v30 }
 0x16b   :  { %v390_v13 = vpop.permute.xlu0 %389 }
 0x16c   :  { %v427_v14 = vadd.f32 %v1813_v9, %v390_v13 }
 0x16e   :  { %v443_v19 = vmul.f32 0.01, %v427_v14  ;;  %vm435_vm8 = vcmp.gt.f32.partialorder %v427_v14, 0.0 }
 0x16f   :  { %v385_v22 = vpop.permute.xlu0 %384  ;;  %v400_v23 = vpop.permute.xlu1 %399 }
 0x170   :  { %v426_v25 = vadd.f32 %v1813_v9, %v385_v22  ;;  %v429_v26 = vadd.f32 %v1813_v9, %v400_v23  ;;  %v451_v27 = vsel %vm435_vm8, %v427_v14, %v443_v19  ;;  %v502_v14 = vunpack.c.0.s8 %v494_v7 }
 0x171   :  { %v1832_v34 = vsel %vm1821_vm9, %v451_v27, -1e+30  ;;  %v505_v27 = vunpack.c.0.s8 %v497_v17  ;;  %vm490_vm8 = vnez %v481_v24 }
 0x172   :  { %v442_v46 = vmul.f32 0.01, %v426_v25  ;;  %v445_v47 = vmul.f32 0.01, %v429_v26  ;;  %v528_v48 = vsel %vm524_vm10, %v1832_v34, -inf  ;;  %vm434_vm12 = vcmp.gt.f32.partialorder %v426_v25, 0.0 }
 0x173   :  { %529 = vmax.xlane.f32.xlu0 %v528_v48  ;;  %vm437_vm13 = vcmp.gt.f32.partialorder %v429_v26, 0.0  ;;  %vm1876_vm5 = vcmp.ne.s32.totalorder %v502_v14, 0 }
 0x174   :  { %v812_v50 = vpop.permute.xlu1 %811  ;;  %v450_v51 = vsel %vm434_vm12, %v426_v25, %v442_v46  ;;  %v453_v52 = vsel %vm437_vm13, %v429_v26, %v445_v47  ;;  %v1844_v55 = vpop.permute.xlu0 %799  ;;  %vm1891_vm12 = vcmp.ne.s32.totalorder %v505_v27, 0 }
 0x175   :  { %v837_v56 = vadd.f32 %v1828_v29, %v812_v50  ;;  %v1849_v57 = vsel %vm1834_vm11, %v450_v51, -1e+30  ;;  %v1855_v61 = vsel %vm1840_vm14, %v453_v52, -1e+30  ;;  %v504_v50 = vunpack.c.0.s8 %v496_v28 }
 0x176   :  { %v525_v59 = vsel %vm524_vm10, %v1849_v57, -inf  ;;  %v534_v4 = vsel %vm524_vm10, %v1855_v61, -inf  ;;  %v834_v62 = vadd.f32 %v1828_v29, %v1844_v55 }
 0x177   :  { %v853_v60 = vmul.f32 0.01, %v837_v56  ;;  %526 = vmax.xlane.f32.xlu1 %v525_v59  ;;  %vm845_vm15 = vcmp.gt.f32.partialorder %v837_v56, 0.0 }
 0x178   :  { %v850_v14 = vmul.f32 0.01, %v834_v62  ;;  %vm842_vm3 = vcmp.gt.f32.partialorder %v834_v62, 0.0 }
 0x179   :  { %v1857_v0 = vpop.permute.xlu1 %394  ;;  %v1859_v1 = vpop.permute.xlu0 %409  ;;  %v861_v2 = vsel %vm845_vm15, %v837_v56, %v853_v60  ;;  %v498_v60 = vsel %vm490_vm8, 16843009, %v1639_v30 }
 0x17a   :  { %v1865_v6 = vsel %vm1840_vm14, %v861_v2, -1e+30  ;;  %vm1907_vm14 = vcmp.ne.s32.totalorder %v504_v50, 0  ;;  %v506_v30 = vunpack.c.0.s8 %v498_v60  ;;  %v428_v17 = vadd.f32 %v1813_v9, %v1857_v0 }
 0x17b   :  { %535 = vmax.xlane.f32.xlu1 %v534_v4  ;;  %v883_v13 = vsel %vm524_vm10, %v1865_v6, -inf  ;;  %v431_v28 = vadd.f32 %v1813_v9, %v1859_v1 }
 0x17c   :  { %vm1930_vm6 = vcmp.ne.s32.totalorder %v506_v30, 0  ;;  %v444_v0 = vmul.f32 0.01, %v428_v17 }
 0x17d   :  { %v1868_v11 = vpop.permute.xlu0 %404  ;;  %v447_v1 = vmul.f32 0.01, %v431_v28 }
 0x17e   :  { %v808_v12 = vpop.permute.xlu1 %807  ;;  %v430_v54 = vadd.f32 %v1813_v9, %v1868_v11 }
 0x17f   :  { %v836_v16 = vadd.f32 %v1828_v29, %v808_v12  ;;  %884 = vmax.xlane.f32.xlu1 %v883_v13 }
 0x180   :  { %v446_v60 = vmul.f32 0.01, %v430_v54 }
 0x181   :  { %v852_v19 = vmul.f32 0.01, %v836_v16  ;;  %v1874_v21 = vpop.permute.xlu0 %419  ;;  %vm844_vm4 = vcmp.gt.f32.partialorder %v836_v16, 0.0 }
 0x182   :  { %v820_v22 = vpop.permute.xlu1 %819  ;;  %v433_v38 = vadd.f32 %v1813_v9, %v1874_v21 }
 0x183   :  { %v839_v25 = vadd.f32 %v1828_v29, %v820_v22  ;;  %v860_v26 = vsel %vm844_vm4, %v836_v16, %v852_v19 }
 0x184   :  { %v1884_v42 = vsel %vm1876_vm5, %v860_v26, -1e+30 }
 0x185   :  { %v855_v46 = vmul.f32 0.01, %v839_v25  ;;  %v880_v47 = vsel %vm524_vm10, %v1884_v42, -inf  ;;  %v1888_v48 = vpop.permute.xlu0 %414  ;;  %vm847_vm7 = vcmp.gt.f32.partialorder %v839_v25, 0.0 }
 0x186   :  { %v816_v49 = vpop.permute.xlu1 %815  ;;  %881 = vmax.xlane.f32.xlu1 %v880_v47  ;;  %v858_v47 = vsel %vm842_vm3, %v834_v62, %v850_v14  ;;  %v432_v23 = vadd.f32 %v1813_v9, %v1888_v48 }
 0x187   :  { %v838_v51 = vadd.f32 %v1828_v29, %v816_v49  ;;  %v863_v53 = vsel %vm847_vm7, %v839_v25, %v855_v46  ;;  %vm436_vm7 = vcmp.gt.f32.partialorder %v428_v17, 0.0 }
 0x188   :  { %v1898_v56 = vsel %vm1891_vm12, %v863_v53, -1e+30  ;;  %v1950_v53 = vsel %vm1834_vm11, %v858_v47, -1e+30  ;;  %v452_v20 = vsel %vm436_vm7, %v428_v17, %v444_v0  ;;  %vm438_vm11 = vcmp.gt.f32.partialorder %v430_v54, 0.0 }
 0x189   :  { %v854_v58 = vmul.f32 0.01, %v838_v51  ;;  %v889_v59 = vsel %vm524_vm10, %v1898_v56, -inf  ;;  %vm846_vm13 = vcmp.gt.f32.partialorder %v838_v51, 0.0  ;;  %v454_v3 = vsel %vm438_vm11, %v430_v54, %v446_v60 }
 0x18a   :  { %890 = vmax.xlane.f32.xlu1 %v889_v59  ;;  %v824_v63 = vpop.permute.xlu1 %823  ;;  %v828_v2 = vpop.permute.xlu0 %827  ;;  %v1958_v59 = vsel %vm1876_vm5, %v452_v20, -1e+30  ;;  %vm441_vm5 = vcmp.gt.f32.partialorder %v433_v38, 0.0  ;;  %v1974_v21 = vsel %vm1907_vm14, %v454_v3, -1e+30  ;;  %vm440_vm8 = vcmp.gt.f32.partialorder %v432_v23, 0.0 }
 0x18b   :  { %v840_v4 = vadd.f32 %v1828_v29, %v824_v63  ;;  %v841_v5 = vadd.f32 %v1828_v29, %v828_v2  ;;  %v862_v8 = vsel %vm846_vm13, %v838_v51, %v854_v58  ;;  %v874_v58 = vsel %vm524_vm10, %v1950_v53, -inf }
 0x18c   :  { %v1913_v10 = vsel %vm1907_vm14, %v862_v8, -1e+30  ;;  %v531_v63 = vsel %vm524_vm10, %v1958_v59, -inf  ;;  %v449_v2 = vmul.f32 0.01, %v433_v38  ;;  %v537_v52 = vsel %vm524_vm10, %v1974_v21, -inf }
 0x18d   :  { %v856_v12 = vmul.f32 0.01, %v840_v4  ;;  %v857_v55 = vmul.f32 0.01, %v841_v5  ;;  %v886_v13 = vsel %vm524_vm10, %v1913_v10, -inf  ;;  %vm849_vm15 = vcmp.gt.f32.partialorder %v841_v5, 0.0 }
 0x18e   :  { %887 = vmax.xlane.f32.xlu1 %v886_v13  ;;  %v804_v15 = vpop.permute.xlu1 %803  ;;  %vm848_vm2 = vcmp.gt.f32.partialorder %v840_v4, 0.0  ;;  %v457_v8 = vsel %vm441_vm5, %v433_v38, %v449_v2 }
 0x18f   :  { %v835_v18 = vadd.f32 %v1828_v29, %v804_v15  ;;  %v865_v19 = vsel %vm849_vm15, %v841_v5, %v857_v55  ;;  %v864_v22 = vsel %vm848_vm2, %v840_v4, %v856_v12  ;;  %v448_v5 = vmul.f32 0.01, %v432_v23 }
 0x190   :  { %v1926_v24 = vsel %vm1917_vm1, %v865_v19, -1e+30  ;;  %v1936_v29 = vsel %vm1930_vm6, %v864_v22, -1e+30  ;;  %v1980_v9 = vsel %vm1917_vm1, %v457_v8, -1e+30 }
 0x191   :  { %v851_v25 = vmul.f32 0.01, %v835_v18  ;;  %v895_v26 = vsel %vm524_vm10, %v1926_v24, -inf  ;;  %vm843_vm4 = vcmp.gt.f32.partialorder %v835_v18, 0.0  ;;  %v892_v51 = vsel %vm524_vm10, %v1936_v29, -inf }
 0x192   :  { %896 = vmax.xlane.f32.xlu1 %v895_v26  ;;  %v456_v48 = vsel %vm440_vm8, %v432_v23, %v448_v5  ;;  %v546_v7 = vsel %vm524_vm10, %v1980_v9, -inf }
 0x193   :  { %v859_v46 = vsel %vm843_vm4, %v835_v18, %v851_v25  ;;  %v1990_v30 = vsel %vm1930_vm6, %v456_v48, -1e+30 }
 0x194   :  { %v1942_v49 = vsel %vm1821_vm9, %v859_v46, -1e+30  ;;  %vm439_vm9 = vcmp.gt.f32.partialorder %v431_v28, 0.0  ;;  %v543_v12 = vsel %vm524_vm10, %v1990_v30, -inf }
 0x195   :  { %v877_v50 = vsel %vm524_vm10, %v1942_v49, -inf  ;;  %v455_v62 = vsel %vm439_vm9, %v431_v28, %v447_v1 }
 0x196   :  { %878 = vmax.xlane.f32.xlu0 %v877_v50  ;;  %893 = vmax.xlane.f32.xlu1 %v892_v51  ;;  %v1966_v11 = vsel %vm1891_vm12, %v455_v62, -1e+30 }
 0x197   :  { %v540_v4 = vsel %vm524_vm10, %v1966_v11, -inf }
 0x19a   :  { %875 = vmax.xlane.f32.xlu0 %v874_v58 }
 0x19e   :  { %532 = vmax.xlane.f32.xlu0 %v531_v63 }
 0x1a2   :  { %541 = vmax.xlane.f32.xlu0 %v540_v4 }
 0x1a6   :  { %538 = vmax.xlane.f32.xlu0 %v537_v52 }
 0x1a7   :  { %1526 = vrot.lane.b32.xlu1 %v1525_v37, %s1641_s5 }
 0x1aa   :  { %547 = vmax.xlane.f32.xlu0 %v546_v7 }
 0x1ae   :  { %544 = vmax.xlane.f32.xlu0 %v543_v12 }
 0x1c4   :  { %1521 = vrot.lane.b32.xlu0 %v1520_v33, %s1641_s5 }
 0x200   :  { %v530_v35 = vpop.xlane.xlu0 %529 }
 0x201   :  { %v550_v36 = vsub.f32 %v1832_v34, %v530_v35 }
 0x203   :  { %v559_v37 = vmul.f32 1.442695, %v550_v36 }
 0x204   :  { %v527_v55 = vpop.xlane.xlu1 %526 }
 0x205   :  { %1540 = vpow2.f32 %v559_v37  ;;  %v549_v1 = vsub.f32 %v1849_v57, %v527_v55 }
 0x207   :  { %v557_v63 = vmul.f32 1.442695, %v549_v1 }
 0x208   :  { %v536_v13 = vpop.xlane.xlu1 %535 }
 0x209   :  { %v552_v14 = vsub.f32 %v1855_v61, %v536_v13 }
 0x20b   :  { %v563_v15 = vmul.f32 1.442695, %v552_v14 }
 0x20c   :  { %v885_v16 = vpop.xlane.xlu1 %884 }
 0x20d   :  { %1542 = vpow2.f32 %v563_v15  ;;  %v901_v17 = vsub.f32 %v1865_v6, %v885_v16 }
 0x20f   :  { %v2001_v18 = vpop.eup %1540  ;;  %v912_v19 = vmul.f32 1.442695, %v901_v17 }
 0x210   :  { %v576_v31 = vsel %vm524_vm10, %v2001_v18, 0.0 }
 0x211   :  { %1544 = vpow2.f32 %v912_v19  ;;  %577 = vadd.xlane.f32.xlu1 %v576_v31 }
 0x213   :  { %v882_v32 = vpop.xlane.xlu1 %881 }
 0x214   :  { %v900_v33 = vsub.f32 %v1884_v42, %v882_v32 }
 0x216   :  { %v910_v34 = vmul.f32 1.442695, %v900_v33 }
 0x217   :  { %v2006_v22 = vpop.eup %1542  ;;  %v891_v61 = vpop.xlane.xlu1 %890 }
 0x218   :  { %1546 = vpow2.f32 %v910_v34  ;;  %v903_v25 = vsub.f32 %v1898_v56, %v891_v61  ;;  %v582_v6 = vsel %vm524_vm10, %v2006_v22, 0.0 }
 0x219   :  { %583 = vadd.xlane.f32.xlu1 %v582_v6 }
 0x21a   :  { %v916_v26 = vmul.f32 1.442695, %v903_v25 }
 0x21b   :  { %v2011_v27 = vpop.eup %1544  ;;  %v888_v0 = vpop.xlane.xlu1 %887 }
 0x21c   :  { %1548 = vpow2.f32 %v916_v26  ;;  %v902_v28 = vsub.f32 %v1913_v10, %v888_v0  ;;  %v931_v42 = vsel %vm524_vm10, %v2011_v27, 0.0 }
 0x21d   :  { %932 = vadd.xlane.f32.xlu1 %v931_v42 }
 0x21e   :  { %v914_v46 = vmul.f32 1.442695, %v902_v28 }
 0x21f   :  { %v897_v47 = vpop.xlane.xlu1 %896 }
 0x220   :  { %1550 = vpow2.f32 %v914_v46  ;;  %v905_v56 = vsub.f32 %v1926_v24, %v897_v47 }
 0x222   :  { %v2017_v50 = vpop.eup %1546  ;;  %v920_v51 = vmul.f32 1.442695, %v905_v56 }
 0x223   :  { %v894_v54 = vpop.xlane.xlu1 %893  ;;  %v879_v20 = vpop.xlane.xlu0 %878  ;;  %v928_v58 = vsel %vm524_vm10, %v2017_v50, 0.0 }
 0x224   :  { %1552 = vpow2.f32 %v920_v51  ;;  %v904_v10 = vsub.f32 %v1936_v29, %v894_v54  ;;  %v899_v60 = vsub.f32 %v1942_v49, %v879_v20  ;;  %929 = vadd.xlane.f32.xlu1 %v928_v58 }
 0x226   :  { %v2024_v38 = vpop.eup %1548  ;;  %v918_v62 = vmul.f32 1.442695, %v904_v10  ;;  %v908_v24 = vmul.f32 1.442695, %v899_v60 }
 0x227   :  { %v876_v2 = vpop.xlane.xlu0 %875  ;;  %v937_v57 = vsel %vm524_vm10, %v2024_v38, 0.0  ;;  %v1527_v61 = vpop.permute.xlu1 %1526 }
 0x228   :  { %1554 = vpow2.f32 %v918_v62  ;;  %v898_v23 = vsub.f32 %v1950_v53, %v876_v2  ;;  %938 = vadd.xlane.f32.xlu1 %v937_v57  ;;  %v1529_v42 = vunpack.i.h.bf16 %v1527_v61  ;;  %v1528_v46 = vunpack.i.l.bf16 %v1527_v61 }
 0x229   :  { %1556 = vpow2.f32 %v908_v24 }
 0x22a   :  { %v2029_v3 = vpop.eup %1550  ;;  %1558 = vpow2.f32 %v557_v63  ;;  %v906_v29 = vmul.f32 1.442695, %v898_v23  ;;  %v2072_v51 = vpack.c.bf16 %v1529_v42, %v1528_v46 }
 0x22b   :  { %v533_v49 = vpop.xlane.xlu0 %532  ;;  %v934_v4 = vsel %vm524_vm10, %v2029_v3, 0.0 }
 0x22c   :  { %v551_v5 = vsub.f32 %v1958_v59, %v533_v49  ;;  %935 = vadd.xlane.f32.xlu1 %v934_v4  ;;  %1560 = vpow2.f32 %v906_v29 }
 0x22e   :  { %v2034_v8 = vpop.eup %1552  ;;  %v561_v52 = vmul.f32 1.442695, %v551_v5 }
 0x22f   :  { %v542_v48 = vpop.xlane.xlu0 %541  ;;  %v943_v53 = vsel %vm524_vm10, %v2034_v8, 0.0 }
 0x230   :  { %v554_v7 = vsub.f32 %v1966_v11, %v542_v48  ;;  %944 = vadd.xlane.f32.xlu1 %v943_v53  ;;  %1562 = vpow2.f32 %v561_v52 }
 0x232   :  { %v2039_v12 = vpop.eup %1554  ;;  %v567_v36 = vmul.f32 1.442695, %v554_v7 }
 0x233   :  { %v2041_v35 = vpop.eup %1556  ;;  %v539_v37 = vpop.xlane.xlu0 %538  ;;  %v940_v59 = vsel %vm524_vm10, %v2039_v12, 0.0 }
 0x234   :  { %v553_v55 = vsub.f32 %v1974_v21, %v539_v37  ;;  %941 = vadd.xlane.f32.xlu1 %v940_v59  ;;  %v925_v13 = vsel %vm524_vm10, %v2041_v35, 0.0  ;;  %v2048_v14 = vpop.eup %1558  ;;  %1564 = vpow2.f32 %v567_v36 }
 0x235   :  { %926 = vadd.xlane.f32.xlu0 %v925_v13  ;;  %v573_v17 = vsel %vm524_vm10, %v2048_v14, 0.0 }
 0x236   :  { %v565_v11 = vmul.f32 1.442695, %v553_v55  ;;  %v2053_v19 = vpop.eup %1560 }
 0x237   :  { %v548_v15 = vpop.xlane.xlu0 %547  ;;  %v922_v33 = vsel %vm524_vm10, %v2053_v19, 0.0 }
 0x238   :  { %v556_v16 = vsub.f32 %v1980_v9, %v548_v15  ;;  %1566 = vpow2.f32 %v565_v11 }
 0x239   :  { %574 = vadd.xlane.f32.xlu0 %v573_v17 }
 0x23a   :  { %v571_v21 = vmul.f32 1.442695, %v556_v16  ;;  %v2058_v34 = vpop.eup %1562 }
 0x23b   :  { %v545_v31 = vpop.xlane.xlu0 %544  ;;  %v579_v0 = vsel %vm524_vm10, %v2058_v34, 0.0 }
 0x23c   :  { %v555_v32 = vsub.f32 %v1990_v30, %v545_v31  ;;  %1568 = vpow2.f32 %v571_v21 }
 0x23d   :  { %923 = vadd.xlane.f32.xlu0 %v922_v33 }
 0x23e   :  { %v569_v9 = vmul.f32 1.442695, %v555_v32  ;;  %v2062_v28 = vpop.eup %1564 }
 0x23f   :  { %v1522_v25 = vpop.permute.xlu0 %1521  ;;  %v588_v47 = vsel %vm524_vm10, %v2062_v28, 0.0 }
 0x240   :  { %v1524_v6 = vunpack.i.h.bf16 %v1522_v25  ;;  %v1523_v26 = vunpack.i.l.bf16 %v1522_v25  ;;  %1570 = vpow2.f32 %v569_v9 }
 0x241   :  { %580 = vadd.xlane.f32.xlu0 %v579_v0 }
 0x242   :  { %v2064_v30 = vpack.c.bf16 %v1524_v6, %v1523_v26  ;;  %v2070_v56 = vpop.eup %1566 }
 0x243   :  { %v585_v1 = vsel %vm524_vm10, %v2070_v56, 0.0 }
 0x244   :  { %1482 = vmatprep.subr.bf16.mxu0 %v2064_v30  ;;  %1497 = vmatprep.subr.bf16.mxu1 %v2064_v30 }
 0x245   :  { %589 = vadd.xlane.f32.xlu0 %v588_v47  ;;  %1531 = vrot.lane.b32.xlu1 %v1530_v41, %s1641_s5 }
 0x246   :  { %1501 = vmatpush3.bf16.msra.mxu1 %v2064_v30  ;;  %v2082_v54 = vpop.eup %1568 }
 0x247   :  { %1498 = vmatprep.subr.bf16.mxu1 %v2072_v51  ;;  %v594_v20 = vsel %vm524_vm10, %v2082_v54, 0.0 }
 0x249   :  { %586 = vadd.xlane.f32.xlu0 %v585_v1 }
 0x24a   :  { %1502 = vmatpush3.bf16.msra.mxu1 %v2072_v51  ;;  %v2087_v58 = vpop.eup %1570 }
 0x24b   :  { %v591_v39 = vsel %vm524_vm10, %v2087_v58, 0.0 }
 0x24d   :  { %595 = vadd.xlane.f32.xlu0 %v594_v20 }
 0x251   :  { %592 = vadd.xlane.f32.xlu0 %v591_v39 }
 0x267   :  { %1536 = vrot.lane.b32.xlu0 %v1535_v45, %s1641_s5 }
 0x29e   :  { %v578_v40 = vpop.xlane.xlu1 %577 }
 0x29f   :  { %v598_v43 = vmax.f32 %v578_v40, 1e-30 }
 0x2a6   :  { %v584_v41 = vpop.xlane.xlu1 %583 }
 0x2a7   :  { %v600_v7 = vmax.f32 %v584_v41, 1e-30 }
 0x2aa   :  { %v933_v10 = vpop.xlane.xlu1 %932 }
 0x2ab   :  { %v949_v21 = vmax.f32 %v933_v10, 1e-30 }
 0x2b1   :  { %v930_v60 = vpop.xlane.xlu1 %929 }
 0x2b2   :  { %v948_v62 = vmax.f32 %v930_v60, 1e-30 }
 0x2b4   :  { %1572 = vrcp.f32 %v948_v62 }
 0x2b5   :  { %v939_v24 = vpop.xlane.xlu1 %938  ;;  %1574 = vrcp.f32 %v598_v43 }
 0x2b6   :  { %v951_v31 = vmax.f32 %v939_v24, 1e-30 }
 0x2b9   :  { %v936_v63 = vpop.xlane.xlu1 %935 }
 0x2ba   :  { %v950_v33 = vmax.f32 %v936_v63, 1e-30 }
 0x2bd   :  { %v2095_v2 = vpop.xlane.xlu1 %944 }
 0x2be   :  { %v1573_v57 = vpop.eup %1572 }
 0x2bf   :  { %v959_v23 = vmul.f32 %v1573_v57, %v2017_v50  ;;  %v1575_v37 = vpop.eup %1574 }
 0x2c0   :  { %v608_v15 = vmul.f32 %v1575_v37, %v2001_v18 }
 0x2c1   :  { %1432 = vmatprep.mubr.msk.f32.mxu1 %vm524_vm10, %v959_v23  ;;  %v942_v29 = vpop.xlane.xlu1 %941 }
 0x2c2   :  { %v2099_v49 = vpop.xlane.xlu0 %926  ;;  %v952_v26 = vmax.f32 %v942_v29, 1e-30 }
 0x2c3   :  { %v947_v46 = vmax.f32 %v2099_v49, 1e-30 }
 0x2c5   :  { %v1532_v44 = vpop.permute.xlu1 %1531 }
 0x2c6   :  { %v1534_v45 = vunpack.i.h.bf16 %v1532_v44  ;;  %v1533_v4 = vunpack.i.l.bf16 %v1532_v44  ;;  %v575_v5 = vpop.xlane.xlu0 %574 }
 0x2c7   :  { %v597_v52 = vmax.f32 %v575_v5, 1e-30 }
 0x2c8   :  { %v1489_v48 = vpack.c.bf16 %v1534_v45, %v1533_v4 }
 0x2c9   :  { %1576 = vrcp.f32 %v597_v52 }
 0x2ca   :  { %v924_v53 = vpop.xlane.xlu0 %923  ;;  %1499 = vmatprep.subr.bf16.mxu1 %v1489_v48  ;;  %1578 = vrcp.f32 %v600_v7 }
 0x2cb   :  { %1503 = vmatpush3.bf16.msra.mxu1 %v1489_v48  ;;  %v946_v9 = vmax.f32 %v924_v53, 1e-30 }
 0x2ce   :  { %v581_v36 = vpop.xlane.xlu0 %580 }
 0x2cf   :  { %v599_v50 = vmax.f32 %v581_v36, 1e-30 }
 0x2d1   :  { %1580 = vrcp.f32 %v599_v50 }
 0x2d2   :  { %v590_v59 = vpop.xlane.xlu0 %589 }
 0x2d3   :  { %v1577_v55 = vpop.eup %1576  ;;  %v602_v13 = vmax.f32 %v590_v59, 1e-30 }
 0x2d4   :  { %v606_v11 = vmul.f32 %v1577_v55, %v2048_v14  ;;  %v1579_v32 = vpop.eup %1578 }
 0x2d5   :  { %1582 = vrcp.f32 %v602_v13  ;;  %v612_v6 = vmul.f32 %v1579_v32, %v2006_v22 }
 0x2d6   :  { %1401 = vmatprep.mubr.msk.f32.mxu0 %vm524_vm10, %v606_v11  ;;  %v587_v16 = vpop.xlane.xlu0 %586 }
 0x2d7   :  { %v601_v17 = vmax.f32 %v587_v16, 1e-30  ;;  %1402 = vmatmul.mubr.msk.f32.vlgmr.msra.gmra.mrb[16].mxu0 %vm524_vm10, %v608_v15 }
 0x2d8   :  { %1484 = vmatpush3.bf16.msra.mxu0 %v2064_v30  ;;  %v953_v30 = vmax.f32 %v2095_v2, 1e-30 }
 0x2d9   :  { %1584 = vrcp.f32 %v601_v17  ;;  %1486 = vmatprep.subr.bf16.mxu0 %v2072_v51 }
 0x2da   :  { %v596_v61 = vpop.xlane.xlu0 %595  ;;  %1586 = vrcp.f32 %v949_v21 }
 0x2db   :  { %v1581_v14 = vpop.eup %1580  ;;  %v604_v18 = vmax.f32 %v596_v61, 1e-30  ;;  %1588 = vrcp.f32 %v951_v31 }
 0x2dc   :  { %1488 = vmatpush3.bf16.msra.mxu0 %v2072_v51  ;;  %v610_v25 = vmul.f32 %v1581_v14, %v2058_v34  ;;  %1590 = vrcp.f32 %v950_v33 }
 0x2dd   :  { %1490 = vmatprep.subr.bf16.mxu0 %v1489_v48  ;;  %1592 = vrcp.f32 %v946_v9 }
 0x2de   :  { %1404 = vmatprep.mubr.msk.f32.mxu0 %vm524_vm10, %v610_v25  ;;  %v593_v0 = vpop.xlane.xlu0 %592  ;;  %1594 = vrcp.f32 %v604_v18 }
 0x2df   :  { %v603_v42 = vmax.f32 %v593_v0, 1e-30  ;;  %1405 = vmatmul.mubr.msk.f32.gmra.mrb[18].mxu0 %vm524_vm10, %v612_v6  ;;  %v1583_v34 = vpop.eup %1582 }
 0x2e0   :  { %1492 = vmatpush3.bf16.msra.mxu0 %v1489_v48  ;;  %v616_v40 = vmul.f32 %v1583_v34, %v2062_v28 }
 0x2e1   :  { %1596 = vrcp.f32 %v603_v42 }
 0x2e2   :  { %1598 = vrcp.f32 %v952_v26  ;;  %v1537_v47 = vpop.permute.xlu0 %1536 }
 0x2e3   :  { %v1585_v22 = vpop.eup %1584  ;;  %v1539_v51 = vunpack.i.h.bf16 %v1537_v47  ;;  %v1538_v1 = vunpack.i.l.bf16 %v1537_v47  ;;  %1600 = vrcp.f32 %v947_v46 }
 0x2e4   :  { %v614_v20 = vmul.f32 %v1585_v22, %v2070_v56  ;;  %1602 = vrcp.f32 %v953_v30  ;;  %v1587_v41 = vpop.eup %1586 }
 0x2e5   :  { %v1493_v39 = vpack.c.bf16 %v1539_v51, %v1538_v1  ;;  %v1589_v10 = vpop.eup %1588  ;;  %v961_v63 = vmul.f32 %v1587_v41, %v2011_v27 }
 0x2e6   :  { %1407 = vmatprep.mubr.msk.f32.mxu0 %vm524_vm10, %v614_v20  ;;  %v1591_v60 = vpop.eup %1590  ;;  %v965_v49 = vmul.f32 %v1589_v10, %v2024_v38 }
 0x2e7   :  { %1408 = vmatmul.mubr.msk.f32.gmra.mrb[20].mxu0 %vm524_vm10, %v616_v40  ;;  %1494 = vmatprep.subr.bf16.mxu0 %v1493_v39  ;;  %v1593_v62 = vpop.eup %1592  ;;  %v963_v2 = vmul.f32 %v1591_v60, %v2029_v3 }
 0x2e8   :  { %1500 = vmatprep.subr.bf16.mxu1 %v1493_v39  ;;  %1496 = vmatpush3.bf16.msra.mxu0 %v1493_v39  ;;  %v1595_v24 = vpop.eup %1594  ;;  %v955_v43 = vmul.f32 %v1593_v62, %v2053_v19 }
 0x2e9   :  { %1504 = vmatpush3.bf16.msra.mxu1 %v1493_v39  ;;  %v620_v23 = vmul.f32 %v1595_v24, %v2082_v54 }
 0x2eb   :  { %v1597_v56 = vpop.eup %1596 }
 0x2ec   :  { %v1599_v57 = vpop.eup %1598  ;;  %1433 = vmatmul.mubr.msk.f32.vlgmr.msra.gmra.mrb[2].mxu1 %vm524_vm10, %v961_v63  ;;  %v618_v28 = vmul.f32 %v1597_v56, %v2087_v58 }
 0x2ed   :  { %1435 = vmatprep.mubr.msk.f32.mxu1 %vm524_vm10, %v963_v2  ;;  %v1601_v29 = vpop.eup %1600  ;;  %v967_v3 = vmul.f32 %v1599_v57, %v2039_v12 }
 0x2ee   :  { %1410 = vmatprep.mubr.msk.f32.mxu0 %vm524_vm10, %v618_v28  ;;  %v1603_v27 = vpop.eup %1602  ;;  %v957_v58 = vmul.f32 %v1601_v29, %v2041_v35 }
 0x2ef   :  { %1411 = vmatmul.mubr.msk.f32.gmra.mrb[22].mxu0 %vm524_vm10, %v620_v23  ;;  %v969_v54 = vmul.f32 %v1603_v27, %v2034_v8 }
 0x2f0   :  { %1436 = vmatmul.mubr.msk.f32.gmra.mrb[4].mxu1 %vm524_vm10, %v965_v49  ;;  %1429 = vmatprep.mubr.msk.f32.mxu0 %vm524_vm10, %v955_v43 }
 0x2f1   :  { %1438 = vmatprep.mubr.msk.f32.mxu1 %vm524_vm10, %v967_v3 }
 0x2f3   :  { %1430 = vmatmul.mubr.msk.f32.vlgmr.msra.gmra.mrb[24].mxu0 %vm524_vm10, %v957_v58 }
 0x2f4   :  { %1439 = vmatmul.mubr.msk.f32.gmra.mrb[6].mxu1 %vm524_vm10, %v969_v54 }
 0x3aa   :  { %v1403_v38 = vpop.f32.mrb[16].mxu0 }
 0x3ab   :  { %v760_v19 = vmul.f32 1.442695, %v1403_v38  ;;  %v711_v44 = vpop.f32.mrb[17].mxu0  ;;  %vm751_vm12 = vcmp.gt.f32.partialorder %v1403_v38, 0.0 }
 0x3ac   :  { %v758_v45 = vmul.f32 1.442695, %v711_v44  ;;  %vm750_vm13 = vcmp.gt.f32.partialorder %v711_v44, 0.0 }
 0x3ad   :  { %1604 = vpow2.f32 %v760_v19 }
 0x3ae   :  { %1606 = vpow2.f32 %v758_v45 }
 0x3b2   :  { %v1406_v12 = vpop.f32.mrb[18].mxu0 }
 0x3b3   :  { %v764_v4 = vmul.f32 1.442695, %v1406_v12  ;;  %v721_v5 = vpop.f32.mrb[19].mxu0  ;;  %vm753_vm10 = vcmp.gt.f32.partialorder %v1406_v12, 0.0 }
 0x3b4   :  { %v762_v52 = vmul.f32 1.442695, %v721_v5  ;;  %vm752_vm14 = vcmp.gt.f32.partialorder %v721_v5, 0.0 }
 0x3b5   :  { %1608 = vpow2.f32 %v764_v4 }
 0x3b6   :  { %1610 = vpow2.f32 %v762_v52 }
 0x3b7   :  { %v1605_v35 = vpop.eup %1604 }
 0x3b8   :  { %v1607_v48 = vpop.eup %1606  ;;  %v1250_v53 = vadd.f32 -1.0, %v1605_v35 }
 0x3b9   :  { %v1249_v8 = vadd.f32 -1.0, %v1607_v48 }
 0x3ba   :  { %v783_v7 = vsel %vm751_vm12, %v1403_v38, %v1250_v53  ;;  %v1409_v36 = vpop.f32.mrb[20].mxu0  ;;  %vm1203_vm12 = vcmask 261248  }
 0x3bb   :  { %791 = vst.msk [vmem:[%s2229_s6 + $0x8] sm:$0xff] %vm35_vm0, %v783_v7  ;;  %v782_v50 = vsel %vm750_vm13, %v711_v44, %v1249_v8  ;;  %v768_v37 = vmul.f32 1.442695, %v1409_v36  ;;  %v731_v59 = vpop.f32.mrb[21].mxu0  ;;  %vm755_vm15 = vcmp.gt.f32.partialorder %v1409_v36, 0.0 }
 0x3bc   :  { %790 = vst.msk [vmem:[%s2229_s6] sm:$0xff] %vm35_vm0, %v782_v50  ;;  %v766_v55 = vmul.f32 1.442695, %v731_v59  ;;  %vm754_vm1 = vcmp.gt.f32.partialorder %v731_v59, 0.0 }
 0x3bd   :  { %1612 = vpow2.f32 %v768_v37 }
 0x3be   :  { %1614 = vpow2.f32 %v766_v55 }
 0x3bf   :  { %v1609_v13 = vpop.eup %1608  ;;  %v1434_v11 = vpop.f32.mrb[2].mxu1 }
 0x3c0   :  { %v1611_v15 = vpop.eup %1610  ;;  %v1252_v16 = vadd.f32 -1.0, %v1609_v13  ;;  %v1145_v17 = vmul.f32 1.442695, %v1434_v11  ;;  %v1102_v21 = vpop.f32.mrb[3].mxu1  ;;  %vm1134_vm2 = vcmp.gt.f32.partialorder %v1434_v11, 0.0 }
 0x3c1   :  { %v1251_v31 = vadd.f32 -1.0, %v1611_v15  ;;  %v1143_v32 = vmul.f32 1.442695, %v1102_v21  ;;  %vm1133_vm3 = vcmp.gt.f32.partialorder %v1102_v21, 0.0 }
 0x3c2   :  { %v785_v33 = vsel %vm753_vm10, %v1406_v12, %v1252_v16  ;;  %1616 = vpow2.f32 %v1145_v17  ;;  %v1412_v61 = vpop.f32.mrb[22].mxu0 }
 0x3c3   :  { %793 = vst.msk [vmem:[%s2229_s6 + $0x18] sm:$0xff] %vm35_vm0, %v785_v33  ;;  %v784_v14 = vsel %vm752_vm14, %v721_v5, %v1251_v31  ;;  %1618 = vpow2.f32 %v1143_v32  ;;  %v772_v9 = vmul.f32 1.442695, %v1412_v61  ;;  %v1437_v18 = vpop.f32.mrb[4].mxu1  ;;  %v741_v25 = vpop.f32.mrb[23].mxu0  ;;  %vm757_vm4 = vcmp.gt.f32.partialorder %v1412_v61, 0.0 }
 0x3c4   :  { %792 = vst.msk [vmem:[%s2229_s6 + $0x10] sm:$0xff] %vm35_vm0, %v784_v14  ;;  %v1149_v6 = vmul.f32 1.442695, %v1437_v18  ;;  %v770_v26 = vmul.f32 1.442695, %v741_v25  ;;  %v1112_v0 = vpop.f32.mrb[5].mxu1 }
 0x3c5   :  { %1620 = vpow2.f32 %v772_v9  ;;  %v1147_v42 = vmul.f32 1.442695, %v1112_v0  ;;  %vm1136_vm6 = vcmp.gt.f32.partialorder %v1437_v18, 0.0  ;;  %vm756_vm7 = vcmp.gt.f32.partialorder %v741_v25, 0.0 }
 0x3c6   :  { %1622 = vpow2.f32 %v1149_v6  ;;  %v2152_v46 = vpop.f32.mrb[24].mxu0  ;;  %vm1135_vm9 = vcmp.gt.f32.partialorder %v1112_v0, 0.0 }
 0x3c7   :  { %v1613_v30 = vpop.eup %1612  ;;  %1624 = vpow2.f32 %v770_v26  ;;  %v1141_v34 = vmul.f32 1.442695, %v2152_v46  ;;  %v2155_v47 = vpop.f32.mrb[6].mxu1  ;;  %vm1132_vm11 = vcmp.gt.f32.partialorder %v2152_v46, 0.0 }
 0x3c8   :  { %v1092_v22 = vpop.f32.mrb[25].mxu0  ;;  %v1615_v51 = vpop.eup %1614  ;;  %v1254_v1 = vadd.f32 -1.0, %v1613_v30  ;;  %1626 = vpow2.f32 %v1147_v42  ;;  %v1153_v20 = vmul.f32 1.442695, %v2155_v47  ;;  %vm1138_vm8 = vcmp.gt.f32.partialorder %v2155_v47, 0.0 }
 0x3c9   :  { %v2158_v39 = vpop.f32.mrb[7].mxu1  ;;  %v1253_v40 = vadd.f32 -1.0, %v1615_v51  ;;  %1628 = vpow2.f32 %v1141_v34  ;;  %v1139_v41 = vmul.f32 1.442695, %v1092_v22  ;;  %vm1131_vm5 = vcmp.gt.f32.partialorder %v1092_v22, 0.0 }
 0x3ca   :  { %v787_v10 = vsel %vm755_vm15, %v1409_v36, %v1254_v1  ;;  %1630 = vpow2.f32 %v1153_v20  ;;  %v1151_v60 = vmul.f32 1.442695, %v2158_v39 }
 0x3cb   :  { %795 = vst.msk [vmem:[%s2229_s6 + $0x28] sm:$0xff] %vm35_vm0, %v787_v10  ;;  %v786_v62 = vsel %vm754_vm1, %v731_v59, %v1253_v40  ;;  %1632 = vpow2.f32 %v1139_v41 }
 0x3cc   :  { %v1617_v24 = vpop.eup %1616  ;;  %794 = vst.msk [vmem:[%s2229_s6 + $0x20] sm:$0xff] %vm35_vm0, %v786_v62  ;;  %1634 = vpow2.f32 %v1151_v60 }
 0x3cd   :  { %v1619_v63 = vpop.eup %1618  ;;  %v1268_v56 = vadd.f32 -1.0, %v1617_v24 }
 0x3ce   :  { %v1267_v2 = vadd.f32 -1.0, %v1619_v63 }
 0x3cf   :  { %v1621_v57 = vpop.eup %1620  ;;  %v1166_v28 = vsel %vm1134_vm2, %v1434_v11, %v1268_v56 }
 0x3d0   :  { %v1623_v23 = vpop.eup %1622  ;;  %v1256_v29 = vadd.f32 -1.0, %v1621_v57  ;;  %1185 = vrot.lane.b32.xlu0 %v1166_v28, %s1642_s24  ;;  %v1165_v49 = vsel %vm1133_vm3, %v1102_v21, %v1267_v2 }
 0x3d1   :  { %v1625_v43 = vpop.eup %1624  ;;  %1183 = vrot.lane.b32.xlu1 %v1165_v49, %s1642_s24  ;;  %v1270_v27 = vadd.f32 -1.0, %v1623_v23 }
 0x3d2   :  { %v1627_v3 = vpop.eup %1626  ;;  %v789_v58 = vsel %vm757_vm4, %v1412_v61, %v1256_v29  ;;  %v1255_v54 = vadd.f32 -1.0, %v1625_v43 }
 0x3d3   :  { %v1629_v38 = vpop.eup %1628  ;;  %797 = vst.msk [vmem:[%s2229_s6 + $0x38] sm:$0xff] %vm35_vm0, %v789_v58  ;;  %v1168_v19 = vsel %vm1136_vm6, %v1437_v18, %v1270_v27  ;;  %v1269_v44 = vadd.f32 -1.0, %v1627_v3 }
 0x3d4   :  { %v1631_v45 = vpop.eup %1630  ;;  %v788_v12 = vsel %vm756_vm7, %v741_v25, %v1255_v54  ;;  %1189 = vrot.lane.b32.xlu0 %v1168_v19, %s1642_s24  ;;  %v1266_v4 = vadd.f32 -1.0, %v1629_v38 }
 0x3d5   :  { %v1633_v5 = vpop.eup %1632  ;;  %796 = vst.msk [vmem:[%s2229_s6 + $0x30] sm:$0xff] %vm35_vm0, %v788_v12  ;;  %v1167_v52 = vsel %vm1135_vm9, %v1112_v0, %v1269_v44  ;;  %v1272_v8 = vadd.f32 -1.0, %v1631_v45  ;;  %vm1137_vm0 = vcmp.gt.f32.partialorder %v2158_v39, 0.0 }
 0x3d6   :  { %v1635_v35 = vpop.eup %1634  ;;  %v1265_v48 = vadd.f32 -1.0, %v1633_v5  ;;  %1187 = vrot.lane.b32.xlu1 %v1167_v52, %s1642_s24  ;;  %v1164_v53 = vsel %vm1132_vm11, %v2152_v46, %v1266_v4 }
 0x3d7   :  { %v1271_v36 = vadd.f32 -1.0, %v1635_v35  ;;  %v1170_v50 = vsel %vm1138_vm8, %v2155_v47, %v1272_v8 }
 0x3d8   :  { %1181 = vrot.lane.b32.xlu0 %v1164_v53, %s1642_s24  ;;  %v1163_v7 = vsel %vm1131_vm5, %v1092_v22, %v1265_v48 }
 0x3d9   :  { %v1169_v37 = vsel %vm1137_vm0, %v2158_v39, %v1271_v36 }
 0x3da   :  { %1179 = vrot.lane.b32.xlu1 %v1163_v7, %s1642_s24 }
 0x3dc   :  { %1193 = vrot.lane.b32.xlu0 %v1170_v50, %s1642_s24 }
 0x3de   :  { %1191 = vrot.lane.b32.xlu1 %v1169_v37, %s1642_s24 }
 0x442   :  { %v1186_v59 = vpop.permute.xlu0 %1185 }
 0x443   :  { %1207 = vst.msk [vmem:[%s2229_s6 + $0x18] sm:$0xff] %vm1203_vm12, %v1186_v59  ;;  %v1184_v55 = vpop.permute.xlu1 %1183 }
 0x444   :  { %1206 = vst.msk [vmem:[%s2229_s6 + $0x10] sm:$0xff] %vm1203_vm12, %v1184_v55 }
 0x446   :  { %v1190_v13 = vpop.permute.xlu0 %1189 }
 0x447   :  { %1209 = vst.msk [vmem:[%s2229_s6 + $0x28] sm:$0xff] %vm1203_vm12, %v1190_v13 }
 0x448   :  { %v1188_v11 = vpop.permute.xlu1 %1187 }
 0x449   :  { %1208 = vst.msk [vmem:[%s2229_s6 + $0x20] sm:$0xff] %vm1203_vm12, %v1188_v11 }
 0x44a   :  { %v1182_v15 = vpop.permute.xlu0 %1181 }
 0x44b   :  { %1205 = vst.msk [vmem:[%s2229_s6 + $0x8] sm:$0xff] %vm1203_vm12, %v1182_v15 }
 0x44c   :  { %v1180_v16 = vpop.permute.xlu1 %1179 }
 0x44d   :  { %1204 = vst.msk [vmem:[%s2229_s6] sm:$0xff] %vm1203_vm12, %v1180_v16 }
 0x44e   :  { %v1194_v17 = vpop.permute.xlu0 %1193 }
 0x44f   :  { %1211 = vst.msk [vmem:[%s2229_s6 + $0x38] sm:$0xff] %vm1203_vm12, %v1194_v17 }
 0x450   :  { %v1192_v21 = vpop.permute.xlu1 %1191 }
 0x451   :  { %1210 = vst.msk [vmem:[%s2229_s6 + $0x30] sm:$0xff] %vm1203_vm12, %v1192_v21 }

</bundles_post_ra>
